<compile_context>
chip_gen: v6e
topology: v6e:2x2x1
jax: 0.10.0
libtpu: 0.0.40
codegen_flags: <defaults>
</compile_context>

<pallas_src>
import functools

import numpy as np
import jax
import jax.numpy as jnp
from jax import lax
from jax.experimental import pallas as pl
from jax.experimental.pallas import tpu as pltpu


def _dwconv3x3_kernel(x_ref, w_ref, m_ref, o_ref, *, H, W, chunk):
    """One (channel-block, batch) grid step.

    x_ref: (1, Cb, H*W + 2*(W+1))  spatially pre-padded rows, channels on sublanes
    w_ref: (Cb, 9)                 per-channel taps, k = kh*3 + kw
    m_ref: (2, H*W)                f32 keep-masks: row 0 for kw==0, row 1 for kw==2
    o_ref: (1, Cb, H*W)
    """
    HW = H * W
    padw = W + 1
    Cb = o_ref.shape[1]
    n_chunks = Cb // chunk

    # Hoisted once per grid step.
    m_kw0 = m_ref[0:1, :]  # (1, HW): keep where w > 0
    m_kw2 = m_ref[1:2, :]  # (1, HW): keep where w < W-1

    @pl.loop(0, n_chunks)
    def _(i):
        c0 = i * chunk
        if chunk % 8 == 0:
            c0 = pl.multiple_of(c0, 8)
        # Per-chunk working set (~8 vregs input + ~8 vregs accumulator) lives
        # in registers; stores go straight to the output block.
        xp = x_ref[0, pl.ds(c0, chunk), :].astype(jnp.float32)   # (chunk, HW+2*padw)
        wc = w_ref[pl.ds(c0, chunk), :].astype(jnp.float32)      # (chunk, 9)

        acc = None
        for kh in range(3):
            for kw in range(3):
                off = (kh - 1) * W + (kw - 1)
                s = xp[:, padw + off: padw + off + HW]           # (chunk, HW)
                # Fix the W-boundary wrap of the flattened spatial axis.
                if kw == 0:
                    s = s * m_kw0
                elif kw == 2:
                    s = s * m_kw2
                k = kh * 3 + kw
                t = s * wc[:, k:k + 1]                           # per-channel tap
                acc = t if acc is None else acc + t
        o_ref[0, pl.ds(c0, chunk), :] = acc.astype(o_ref.dtype)


def _num_channel_blocks(C):
    """2 blocks on v7x (one per TensorCore), 1 elsewhere (v5e/v6e are 1-TC)."""
    nb = 1
    try:
        kind = jax.devices()[0].device_kind.lower()
        if "v7" in kind or "7x" in kind:
            nb = 2
    except Exception:
        nb = 1
    if nb > 1 and (C % nb != 0 or (C // nb) % 8 != 0):
        nb = 1
    return nb


def _pick_chunk(Cb):
    for ch in (64, 32, 16, 8):
        if Cb % ch == 0:
            return ch
    return Cb


def depthwise_conv3x3(x_nchw, w_oihw):
    """Depthwise 3x3 conv, stride 1, pad 1, no bias.

    x_nchw: (N, C, H, W)
    w_oihw: (C, 1, 3, 3)   (PyTorch depthwise layout)
    returns (N, C, H, W)
    """
    N, C, H, W = x_nchw.shape
    assert w_oihw.shape == (C, 1, 3, 3)
    HW = H * W
    padw = W + 1

    nb = _num_channel_blocks(C)
    Cb = C // nb
    chunk = _pick_chunk(Cb)

    # Free (bitcast) reshapes -- no HBM layout passes.
    x_flat = x_nchw.reshape(N, C, HW)
    w_flat = w_oihw.reshape(C, 9)
    # Cheap 1-D halo pad in HBM (~0.1 MB extra traffic at this shape), far
    # cheaper than the two ~1 MB NCHW<->NHWC transpose passes it replaces.
    x_pad = jnp.pad(x_flat, ((0, 0), (0, 0), (padw, padw)))

    # Keep-masks fixing the W wrap-around of the flattened HW axis:
    #   row 0: kw==0 taps (x[h, w-1]) -> drop outputs at w == 0
    #   row 1: kw==2 taps (x[h, w+1]) -> drop outputs at w == W-1
    wpos = np.arange(HW, dtype=np.int64) % W
    masks = jnp.asarray(
        np.stack([wpos != 0, wpos != W - 1]).astype(np.float32))  # (2, HW)

    kernel = functools.partial(_dwconv3x3_kernel, H=H, W=W, chunk=chunk)

    out_flat = pl.pallas_call(
        kernel,
        out_shape=jax.ShapeDtypeStruct((N, C, HW), x_nchw.dtype),
        grid=(nb, N),  # channel-block axis leading: shards across v7x TCs
        in_specs=[
            pl.BlockSpec((1, Cb, HW + 2 * padw), lambda c, n: (n, c, 0)),
            pl.BlockSpec((Cb, 9), lambda c, n: (c, 0)),
            pl.BlockSpec((2, HW), lambda c, n: (0, 0)),
        ],
        out_specs=pl.BlockSpec((1, Cb, HW), lambda c, n: (n, c, 0)),
        compiler_params=pltpu.CompilerParams(
            dimension_semantics=("parallel", "parallel"),
        ),
    )(x_pad, w_flat, masks)

    return out_flat.reshape(N, C, H, W)


def _reference(x_nchw, w_oihw):
    C = x_nchw.shape[1]
    return lax.conv_general_dilated(
        x_nchw, w_oihw,
        window_strides=(1, 1),
        padding=((1, 1), (1, 1)),
        dimension_numbers=("NCHW", "OIHW", "NCHW"),
        feature_group_count=C,
    )


if __name__ == "__main__":
    key = jax.random.PRNGKey(0)
    k1, k2, k3, k4 = jax.random.split(key, 4)

    # Small smoke test (same op, fewer channels; module spatial size is 7x7).
    xs = jax.random.normal(k1, (1, 256, 7, 7), dtype=jnp.float32)
    ws = jax.random.normal(k2, (256, 1, 3, 3), dtype=jnp.float32) * 0.1
    outs = jax.block_until_ready(depthwise_conv3x3(xs, ws))
    refs = _reference(xs, ws)
    assert outs.shape == (1, 256, 7, 7)
    assert jnp.allclose(outs, refs, atol=1e-4, rtol=1e-4), "small-shape mismatch"

    # Real module shape: (1, 2304, 7, 7) with C=2304 depthwise filters.
    x = jax.random.normal(k3, (1, 2304, 7, 7), dtype=jnp.float32)
    w = jax.random.normal(k4, (2304, 1, 3, 3), dtype=jnp.float32) * 0.1
    out = jax.block_until_ready(depthwise_conv3x3(x, w))
    ref = _reference(x, w)
    assert out.shape == (1, 2304, 7, 7)
    assert jnp.allclose(out, ref, atol=1e-4, rtol=1e-4), "full-shape mismatch"

    print("KERNEL_OK")
</pallas_src>

<mosaic_0001>
module attributes {stable_mosaic.version = 11 : i64} {
  func.func @_dwconv3x3_kernel(%arg0: i32, %arg1: i32, %arg2: memref<1x256x65xf32, #tpu.memory_space<vmem>>, %arg3: memref<256x9xf32, #tpu.memory_space<vmem>>, %arg4: memref<2x49xf32, #tpu.memory_space<vmem>>, %arg5: memref<1x256x49xf32, #tpu.memory_space<vmem>>) attributes {dimension_semantics = [#tpu.dimension_semantics<parallel>, #tpu.dimension_semantics<parallel>], iteration_bounds = array<i64: 1, 1>, scalar_prefetch = 0 : i64, scratch_operands = 0 : i64, tpu.core_type = #tpu.core_type<tc>, window_params = [{transform_indices = @transform_0, window_bounds = array<i64: 1, 256, 65>}, {transform_indices = @transform_1, window_bounds = array<i64: 256, 9>}, {pipeline_mode = #tpu.pipeline_mode<synchronous>, transform_indices = @transform_2, window_bounds = array<i64: 2, 49>}, {transform_indices = @transform_3, window_bounds = array<i64: 1, 256, 49>}]} {
    %c0 = arith.constant 0 : index
    %c0_0 = arith.constant 0 : index
    %0 = vector.load %arg4[%c0, %c0_0] : memref<2x49xf32, #tpu.memory_space<vmem>>, vector<1x49xf32>
    %c1 = arith.constant 1 : index
    %c0_1 = arith.constant 0 : index
    %1 = vector.load %arg4[%c1, %c0_1] : memref<2x49xf32, #tpu.memory_space<vmem>>, vector<1x49xf32>
    %c0_i32 = arith.constant 0 : i32
    %c4_i32 = arith.constant 4 : i32
    %2 = arith.addi %c0_i32, %c4_i32 : i32
    %c1_i32 = arith.constant 1 : i32
    scf.for %arg6 = %c0_i32 to %2 step %c1_i32  : i32 {
      %c1_i32_3 = arith.constant 1 : i32
      %3 = arith.muli %arg6, %c1_i32_3 : i32
      %c0_i32_4 = arith.constant 0 : i32
      %4 = arith.addi %c0_i32_4, %3 : i32
      %c64_i32 = arith.constant 64 : i32
      %5 = arith.muli %4, %c64_i32 : i32
      %6 = tpu.assume_multiple %5, 8 : i32
      %c0_5 = arith.constant 0 : index
      %7 = arith.index_cast %6 : i32 to index
      %c0_6 = arith.constant 0 : index
      %8 = vector.load %arg2[%c0_5, %7, %c0_6] : memref<1x256x65xf32, #tpu.memory_space<vmem>>, vector<1x64x65xf32>
      %9 = vector.shape_cast %8 : vector<1x64x65xf32> to vector<64x65xf32>
      %10 = arith.index_cast %6 : i32 to index
      %c0_7 = arith.constant 0 : index
      %11 = vector.load %arg3[%10, %c0_7] : memref<256x9xf32, #tpu.memory_space<vmem>>, vector<64x9xf32>
      %12 = vector.extract_strided_slice %9 {offsets = [0, 0], sizes = [64, 49], strides = [1, 1]} : vector<64x65xf32> to vector<64x49xf32>
      %13 = vector.broadcast %0 : vector<1x49xf32> to vector<64x49xf32>
      %14 = arith.mulf %12, %13 : vector<64x49xf32>
      %15 = vector.extract_strided_slice %11 {offsets = [0, 0], sizes = [64, 1], strides = [1, 1]} : vector<64x9xf32> to vector<64x1xf32>
      %16 = vector.broadcast %15 : vector<64x1xf32> to vector<64x49xf32>
      %17 = arith.mulf %14, %16 : vector<64x49xf32>
      %18 = vector.extract_strided_slice %9 {offsets = [0, 1], sizes = [64, 49], strides = [1, 1]} : vector<64x65xf32> to vector<64x49xf32>
      %19 = vector.extract_strided_slice %11 {offsets = [0, 1], sizes = [64, 1], strides = [1, 1]} : vector<64x9xf32> to vector<64x1xf32>
      %20 = vector.broadcast %19 : vector<64x1xf32> to vector<64x49xf32>
      %21 = arith.mulf %18, %20 : vector<64x49xf32>
      %22 = arith.addf %17, %21 : vector<64x49xf32>
      %23 = vector.extract_strided_slice %9 {offsets = [0, 2], sizes = [64, 49], strides = [1, 1]} : vector<64x65xf32> to vector<64x49xf32>
      %24 = vector.broadcast %1 : vector<1x49xf32> to vector<64x49xf32>
      %25 = arith.mulf %23, %24 : vector<64x49xf32>
      %26 = vector.extract_strided_slice %11 {offsets = [0, 2], sizes = [64, 1], strides = [1, 1]} : vector<64x9xf32> to vector<64x1xf32>
      %27 = vector.broadcast %26 : vector<64x1xf32> to vector<64x49xf32>
      %28 = arith.mulf %25, %27 : vector<64x49xf32>
      %29 = arith.addf %22, %28 : vector<64x49xf32>
      %30 = vector.extract_strided_slice %9 {offsets = [0, 7], sizes = [64, 49], strides = [1, 1]} : vector<64x65xf32> to vector<64x49xf32>
      %31 = vector.broadcast %0 : vector<1x49xf32> to vector<64x49xf32>
      %32 = arith.mulf %30, %31 : vector<64x49xf32>
      %33 = vector.extract_strided_slice %11 {offsets = [0, 3], sizes = [64, 1], strides = [1, 1]} : vector<64x9xf32> to vector<64x1xf32>
      %34 = vector.broadcast %33 : vector<64x1xf32> to vector<64x49xf32>
      %35 = arith.mulf %32, %34 : vector<64x49xf32>
      %36 = arith.addf %29, %35 : vector<64x49xf32>
      %37 = vector.extract_strided_slice %9 {offsets = [0, 8], sizes = [64, 49], strides = [1, 1]} : vector<64x65xf32> to vector<64x49xf32>
      %38 = vector.extract_strided_slice %11 {offsets = [0, 4], sizes = [64, 1], strides = [1, 1]} : vector<64x9xf32> to vector<64x1xf32>
      %39 = vector.broadcast %38 : vector<64x1xf32> to vector<64x49xf32>
      %40 = arith.mulf %37, %39 : vector<64x49xf32>
      %41 = arith.addf %36, %40 : vector<64x49xf32>
      %42 = vector.extract_strided_slice %9 {offsets = [0, 9], sizes = [64, 49], strides = [1, 1]} : vector<64x65xf32> to vector<64x49xf32>
      %43 = vector.broadcast %1 : vector<1x49xf32> to vector<64x49xf32>
      %44 = arith.mulf %42, %43 : vector<64x49xf32>
      %45 = vector.extract_strided_slice %11 {offsets = [0, 5], sizes = [64, 1], strides = [1, 1]} : vector<64x9xf32> to vector<64x1xf32>
      %46 = vector.broadcast %45 : vector<64x1xf32> to vector<64x49xf32>
      %47 = arith.mulf %44, %46 : vector<64x49xf32>
      %48 = arith.addf %41, %47 : vector<64x49xf32>
      %49 = vector.extract_strided_slice %9 {offsets = [0, 14], sizes = [64, 49], strides = [1, 1]} : vector<64x65xf32> to vector<64x49xf32>
      %50 = vector.broadcast %0 : vector<1x49xf32> to vector<64x49xf32>
      %51 = arith.mulf %49, %50 : vector<64x49xf32>
      %52 = vector.extract_strided_slice %11 {offsets = [0, 6], sizes = [64, 1], strides = [1, 1]} : vector<64x9xf32> to vector<64x1xf32>
      %53 = vector.broadcast %52 : vector<64x1xf32> to vector<64x49xf32>
      %54 = arith.mulf %51, %53 : vector<64x49xf32>
      %55 = arith.addf %48, %54 : vector<64x49xf32>
      %56 = vector.extract_strided_slice %9 {offsets = [0, 15], sizes = [64, 49], strides = [1, 1]} : vector<64x65xf32> to vector<64x49xf32>
      %57 = vector.extract_strided_slice %11 {offsets = [0, 7], sizes = [64, 1], strides = [1, 1]} : vector<64x9xf32> to vector<64x1xf32>
      %58 = vector.broadcast %57 : vector<64x1xf32> to vector<64x49xf32>
      %59 = arith.mulf %56, %58 : vector<64x49xf32>
      %60 = arith.addf %55, %59 : vector<64x49xf32>
      %61 = vector.extract_strided_slice %9 {offsets = [0, 16], sizes = [64, 49], strides = [1, 1]} : vector<64x65xf32> to vector<64x49xf32>
      %62 = vector.broadcast %1 : vector<1x49xf32> to vector<64x49xf32>
      %63 = arith.mulf %61, %62 : vector<64x49xf32>
      %64 = vector.extract_strided_slice %11 {offsets = [0, 8], sizes = [64, 1], strides = [1, 1]} : vector<64x9xf32> to vector<64x1xf32>
      %65 = vector.broadcast %64 : vector<64x1xf32> to vector<64x49xf32>
      %66 = arith.mulf %63, %65 : vector<64x49xf32>
      %67 = arith.addf %60, %66 : vector<64x49xf32>
      %c0_8 = arith.constant 0 : index
      %68 = arith.index_cast %6 : i32 to index
      %c0_9 = arith.constant 0 : index
      %69 = vector.load %arg5[%c0_8, %68, %c0_9] : memref<1x256x49xf32, #tpu.memory_space<vmem>>, vector<1x64x49xf32>
      %70 = vector.shape_cast %69 : vector<1x64x49xf32> to vector<64x49xf32>
      %71 = vector.shape_cast %67 : vector<64x49xf32> to vector<1x64x49xf32>
      tpu.vector_store %arg5[%c0_8, %68, %c0_9], %71 {strides = array<i32>} : memref<1x256x49xf32, #tpu.memory_space<vmem>>, vector<1x64x49xf32>,
    }
    %c4_i32_2 = arith.constant 4 : i32
    return
  }
  func.func @transform_0(%arg0: i32, %arg1: i32) -> (i32, i32, i32) {
    %c0_i32 = arith.constant 0 : i32
    %c0_i32_0 = arith.constant 0 : i32
    return %arg1, %arg0, %c0_i32 : i32, i32, i32
  }
  func.func @transform_1(%arg0: i32, %arg1: i32) -> (i32, i32) {
    %c0_i32 = arith.constant 0 : i32
    %c0_i32_0 = arith.constant 0 : i32
    return %arg0, %c0_i32 : i32, i32
  }
  func.func @transform_2(%arg0: i32, %arg1: i32) -> (i32, i32) {
    %c0_i32 = arith.constant 0 : i32
    %c0_i32_0 = arith.constant 0 : i32
    %c0_i32_1 = arith.constant 0 : i32
    return %c0_i32, %c0_i32_0 : i32, i32
  }
  func.func @transform_3(%arg0: i32, %arg1: i32) -> (i32, i32, i32) {
    %c0_i32 = arith.constant 0 : i32
    %c0_i32_0 = arith.constant 0 : i32
    return %arg1, %arg0, %c0_i32 : i32, i32, i32
  }
}

</mosaic_0001>

<bundles_post_ra>
// kernel: tpu_custom_call.1
= control target key start
LH: loop header
LB: loop body
LE: loop exit
PB: predicated region body
PF: predicated region fallthrough
CT: control target
= control target key end

     0   :  { %s938_s16 = smov 0   ;;  %s1270_s0 = inlined_call_operand.vmem [shape: f32[1,256,65], index: 0, kind: input, shape index: {}]   ;;  %s1271_s1 = inlined_call_operand.vmem [shape: f32[256,9], index: 1, kind: input, shape index: {}]   ;;  %s1272_s2 = inlined_call_operand.vmem [shape: f32[2,49], index: 2, kind: input, shape index: {}]   ;;  %s1273_s3 = inlined_call_operand.vmem [shape: f32[1,256,49], index: 3, kind: output, shape index: {}]  }
   0x1   :  { %v931_v0 = vld [vmem:[%s1272_s2] ss:$0 sm:$0xff]  ;;  %v936_v1 = vld [vmem:[%s1272_s2 + $0x1] ss:$0 sm:$0xff] }
   0x2 LB: > { %v886_v2 = vmov 0   ;;  %s944_s17 = sshll.u32 %s884_s16, 6  ;;  %v887_v11 = vmov 1   ;;  %s888_s2 = smov 2   ;;  %v889_v12 = vmov 2   ;;  %v890_v13 = vmov 3   ;;  %s884_s16 = sphi %s938_s16, %s21_s16  }
   0x3   : > { %861 = vset.pattern.permute.xlu1 %v886_v2  ;;  %860 = vset.pattern.permute.xlu0 %v886_v2  ;;  %s32_s20 = scalar_lea.vmem %s1271_s1, %s944_s17  ;;  %s891_s21 = smov 7   ;;  %v892_v14 = vmov 4   ;;  %vm803_vm0 = vcmask 400384  }
   0x4   : > { %v950_v3 = vld [vmem:[%s32_s20 + $0x10] sm:$0xff]  ;;  %v952_v4 = vld [vmem:[%s32_s20] sm:$0xff]  ;;  %v956_v5 = vld [vmem:[%s32_s20 + $0x18] sm:$0xff]  ;;  %s23_s24 = scalar_lea.vmem %s1270_s0, %s944_s17  ;;  %s893_s25 = smov 127  }
   0x5   : > { %65 = vperm.xlu1 %861, %v950_v3   ;;  %55 = vperm.xlu0 %860, %v952_v4   ;;  %v958_v6 = vld [vmem:[%s32_s20 + $0x8] sm:$0xff]  ;;  %v964_v8 = vld [vmem:[%s32_s20 + $0x20] sm:$0xff]  ;;  %v968_v9 = vld [vmem:[%s32_s20 + $0x38] sm:$0xff]  ;;  %s894_s26 = smov 126   ;;  %s895_s27 = smov 121  }
   0x6   : > { %v962_v7 = vld [vmem:[%s32_s20 + $0x28] sm:$0xff]  ;;  %v970_v10 = vld [vmem:[%s32_s20 + $0x30] sm:$0xff]  ;;  %v1024_v23 = vld [vmem:[%s23_s24] sm:$0xff]  ;;  %s896_s28 = smov 120   ;;  %s898_s29 = smov 9  }
   0x7   : > { %v1026_v24 = vld [vmem:[%s23_s24 + $0x8] sm:$0xff]  ;;  %v1030_v29 = vld [vmem:[%s23_s24 + $0x10] sm:$0xff]  ;;  %v1032_v30 = vld [vmem:[%s23_s24 + $0x18] sm:$0xff]  ;;  %s900_s30 = smov 119   ;;  %s901_s4 = smov 14  }
   0x8   : > { %v1036_v35 = vld [vmem:[%s23_s24 + $0x28] sm:$0xff]  ;;  %v1038_v36 = vld [vmem:[%s23_s24 + $0x20] sm:$0xff]  ;;  %v1042_v41 = vld [vmem:[%s23_s24 + $0x38] sm:$0xff]  ;;  %s904_s5 = smov 16   ;;  %s905_s6 = smov 114  }
   0x9   : > { %70 = vperm.xlu1 %861, %v956_v5   ;;  %60 = vperm.xlu0 %860, %v958_v6   ;;  %v1044_v42 = vld [vmem:[%s23_s24 + $0x30] sm:$0xff]  ;;  %s906_s7 = smov 113   ;;  %s907_s8 = smov 112  }
   0xa   : > { %s1243_s11 = scalar_lea.vmem %s1273_s3, %s944_s17  ;;  %s21_s16 = sadd.s32 1, %s884_s16  }
   0xb   : > { %p18_p0 = scmp.ge.s32.totalorder %s21_s16, 4  }
   0xd   : > { %80 = vperm.xlu1 %861, %v962_v7   ;;  %75 = vperm.xlu0 %860, %v964_v8  }
  0x11   : > { %90 = vperm.xlu1 %861, %v968_v9   ;;  %85 = vperm.xlu0 %860, %v970_v10  }
  0x15   : > { %863 = vset.pattern.permute.xlu1 %v887_v11  ;;  %862 = vset.pattern.permute.xlu0 %v887_v11 }
  0x16   : > { %106 = vperm.xlu1 %863, %v958_v6   ;;  %102 = vperm.xlu0 %862, %v952_v4  }
  0x1a   : > { %110 = vperm.xlu1 %863, %v950_v3   ;;  %114 = vperm.xlu0 %862, %v956_v5  }
  0x1e   : > { %118 = vperm.xlu1 %863, %v964_v8   ;;  %122 = vperm.xlu0 %862, %v962_v7  }
  0x22   : > { %126 = vperm.xlu1 %863, %v970_v10   ;;  %130 = vperm.xlu0 %862, %v968_v9  }
  0x26   : > { %186 = vrot.lane.b32.xlu1 %v936_v1, %s888_s2  ;;  %864 = vset.pattern.permute.xlu0 %v889_v12 }
  0x27   : > { %198 = vperm.xlu0 %864, %v952_v4   ;;  %865 = vset.pattern.permute.xlu1 %v889_v12 }
  0x2a   : > { %202 = vperm.xlu1 %865, %v958_v6  }
  0x2b   : > { %210 = vperm.xlu0 %864, %v956_v5  }
  0x2e   : > { %206 = vperm.xlu1 %865, %v950_v3  }
  0x2f   : > { %218 = vperm.xlu0 %864, %v962_v7  }
  0x32   : > { %214 = vperm.xlu1 %865, %v964_v8  }
  0x33   : > { %226 = vperm.xlu0 %864, %v968_v9  }
  0x36   : > { %222 = vperm.xlu1 %865, %v970_v10  }
  0x37   : > { %866 = vset.pattern.permute.xlu0 %v890_v13 }
  0x38   : > { %290 = vperm.xlu0 %866, %v952_v4  }
  0x3a   : > { %278 = vrot.lane.b32.xlu1 %v931_v0, %s891_s21 }
  0x3b   : > { %867 = vset.pattern.permute.xlu1 %v890_v13 }
  0x3c   : > { %302 = vperm.xlu0 %866, %v956_v5  }
  0x3e   : > { %294 = vperm.xlu1 %867, %v958_v6  }
  0x40   : > { %310 = vperm.xlu0 %866, %v962_v7  }
  0x42   : > { %298 = vperm.xlu1 %867, %v950_v3  }
  0x44   : > { %318 = vperm.xlu0 %866, %v968_v9  }
  0x46   : > { %306 = vperm.xlu1 %867, %v964_v8  }
  0x48   : > { %869 = vset.pattern.permute.xlu0 %v892_v14 }
  0x49   : > { %374 = vperm.xlu0 %869, %v958_v6  }
  0x4a   : > { %314 = vperm.xlu1 %867, %v970_v10  }
  0x4e   : > { %868 = vset.pattern.permute.xlu1 %v892_v14 }
  0x4f   : > { %370 = vperm.xlu1 %868, %v952_v4  }
  0x53   : > { %378 = vperm.xlu1 %868, %v950_v3  }
  0x57   : > { %382 = vperm.xlu1 %868, %v956_v5  }
  0x80   : > { %v1004_v15 = vpop.permute.xlu1 %65  ;;  %v1006_v16 = vpop.permute.xlu0 %55 }
  0x84   : > { %v1008_v17 = vpop.permute.xlu1 %70  ;;  %v1010_v18 = vpop.permute.xlu0 %60 }
  0x88   : > { %v1012_v19 = vpop.permute.xlu1 %80  ;;  %v1014_v20 = vpop.permute.xlu0 %75 }
  0x8c   : > { %v1016_v21 = vpop.permute.xlu1 %90  ;;  %v1018_v22 = vpop.permute.xlu0 %85 }
  0x91   : > { %v107_v25 = vpop.permute.xlu1 %106  ;;  %v103_v26 = vpop.permute.xlu0 %102 }
  0x92   : > { %v134_v27 = vmul.f32 %v107_v25, %v1026_v24  ;;  %v133_v28 = vmul.f32 %v103_v26, %v1024_v23 }
  0x94   : > { %151 = vrot.lane.b32.xlu0 %v134_v27, %s893_s25  ;;  %149 = vrot.lane.b32.xlu1 %v133_v28, %s893_s25 }
  0x95   : > { %v111_v31 = vpop.permute.xlu1 %110  ;;  %v115_v32 = vpop.permute.xlu0 %114 }
  0x96   : > { %v135_v33 = vmul.f32 %v111_v31, %v1030_v29  ;;  %v136_v34 = vmul.f32 %v115_v32, %v1032_v30 }
  0x98   : > { %155 = vrot.lane.b32.xlu0 %v136_v34, %s893_s25  ;;  %153 = vrot.lane.b32.xlu1 %v135_v33, %s893_s25 }
  0x99   : > { %v119_v37 = vpop.permute.xlu1 %118  ;;  %v123_v38 = vpop.permute.xlu0 %122 }
  0x9a   : > { %v137_v39 = vmul.f32 %v119_v37, %v1038_v36  ;;  %v138_v40 = vmul.f32 %v123_v38, %v1036_v35 }
  0x9c   : > { %159 = vrot.lane.b32.xlu0 %v138_v40, %s893_s25  ;;  %157 = vrot.lane.b32.xlu1 %v137_v39, %s893_s25 }
  0x9d   : > { %v127_v43 = vpop.permute.xlu1 %126  ;;  %v131_v44 = vpop.permute.xlu0 %130 }
  0x9e   : > { %v139_v45 = vmul.f32 %v127_v43, %v1044_v42  ;;  %v140_v46 = vmul.f32 %v131_v44, %v1042_v41 }
  0xa0   : > { %163 = vrot.lane.b32.xlu0 %v140_v46, %s893_s25  ;;  %161 = vrot.lane.b32.xlu1 %v139_v45, %s893_s25 }
  0xa1   : > { %v187_v47 = vpop.permute.xlu1 %186 }
  0xa2   : > { %v199_v48 = vpop.permute.xlu0 %198  ;;  %v189_v49 = vmul.f32 %v187_v47, %v1024_v23  ;;  %v190_v51 = vmul.f32 %v187_v47, %v1026_v24  ;;  %v192_v55 = vmul.f32 %v187_v47, %v1032_v30  ;;  %v191_v56 = vmul.f32 %v187_v47, %v1030_v29 }
  0xa3   : > { %v194_v61 = vmul.f32 %v187_v47, %v1036_v35  ;;  %v193_v62 = vmul.f32 %v187_v47, %v1038_v36  ;;  %v196_v13 = vmul.f32 %v187_v47, %v1042_v41  ;;  %v195_v14 = vmul.f32 %v187_v47, %v1044_v42 }
  0xa4   : > { %v229_v50 = vmul.f32 %v199_v48, %v189_v49 }
  0xa5   : > { %v203_v52 = vpop.permute.xlu1 %202 }
  0xa6   : > { %v230_v53 = vmul.f32 %v203_v52, %v190_v51  ;;  %v211_v54 = vpop.permute.xlu0 %210  ;;  %245 = vrot.lane.b32.xlu1 %v229_v50, %s894_s26 }
  0xa7   : > { %v232_v58 = vmul.f32 %v211_v54, %v192_v55 }
  0xa8   : > { %247 = vrot.lane.b32.xlu0 %v230_v53, %s894_s26 }
  0xa9   : > { %v207_v57 = vpop.permute.xlu1 %206 }
  0xaa   : > { %v231_v59 = vmul.f32 %v207_v57, %v191_v56  ;;  %v219_v60 = vpop.permute.xlu0 %218 }
  0xab   : > { %v234_v2 = vmul.f32 %v219_v60, %v194_v61 }
  0xac   : > { %251 = vrot.lane.b32.xlu0 %v232_v58, %s894_s26  ;;  %249 = vrot.lane.b32.xlu1 %v231_v59, %s894_s26 }
  0xad   : > { %v215_v63 = vpop.permute.xlu1 %214 }
  0xae   : > { %v233_v11 = vmul.f32 %v215_v63, %v193_v62  ;;  %v227_v12 = vpop.permute.xlu0 %226 }
  0xaf   : > { %v236_v26 = vmul.f32 %v227_v12, %v196_v13  ;;  %v897_v13 = vmov 5  }
  0xb0   : > { %255 = vrot.lane.b32.xlu0 %v234_v2, %s894_s26  ;;  %253 = vrot.lane.b32.xlu1 %v233_v11, %s894_s26 }
  0xb1   : > { %v223_v25 = vpop.permute.xlu1 %222 }
  0xb2   : > { %v235_v27 = vmul.f32 %v223_v25, %v195_v14 }
  0xb3   : > { %v291_v28 = vpop.permute.xlu0 %290 }
  0xb4   : > { %259 = vrot.lane.b32.xlu0 %v236_v26, %s894_s26  ;;  %257 = vrot.lane.b32.xlu1 %v235_v27, %s894_s26 }
  0xb5   : > { %v279_v31 = vpop.permute.xlu1 %278 }
  0xb6   : > { %v281_v32 = vmul.f32 %v279_v31, %v1024_v23  ;;  %v282_v34 = vmul.f32 %v279_v31, %v1026_v24  ;;  %v284_v39 = vmul.f32 %v279_v31, %v1032_v30  ;;  %v283_v43 = vmul.f32 %v279_v31, %v1030_v29 }
  0xb7   : > { %v303_v33 = vpop.permute.xlu0 %302  ;;  %v286_v48 = vmul.f32 %v279_v31, %v1036_v35  ;;  %v285_v49 = vmul.f32 %v279_v31, %v1038_v36  ;;  %v288_v54 = vmul.f32 %v279_v31, %v1042_v41  ;;  %v287_v55 = vmul.f32 %v279_v31, %v1044_v42 }
  0xb8   : > { %v321_v37 = vmul.f32 %v291_v28, %v281_v32  ;;  %v324_v46 = vmul.f32 %v303_v33, %v284_v39 }
  0xb9   : > { %v295_v38 = vpop.permute.xlu1 %294 }
  0xba   : > { %v322_v40 = vmul.f32 %v295_v38, %v282_v34  ;;  %337 = vrot.lane.b32.xlu1 %v321_v37, %s895_s27  ;;  %v48_v34 = vmul.f32 %v931_v0, %v1032_v30 }
  0xbb   : > { %v311_v44 = vpop.permute.xlu0 %310 }
  0xbc   : > { %339 = vrot.lane.b32.xlu0 %v322_v40, %s895_s27  ;;  %v326_v51 = vmul.f32 %v311_v44, %v286_v48  ;;  %v96_v39 = vmul.f32 %v1008_v17, %v48_v34  ;;  %v50_v40 = vmul.f32 %v931_v0, %v1036_v35  ;;  %v51_v34 = vmul.f32 %v931_v0, %v1044_v42 }
  0xbd   : > { %v299_v45 = vpop.permute.xlu1 %298 }
  0xbe   : > { %v323_v47 = vmul.f32 %v299_v45, %v283_v43 }
  0xbf   : > { %v319_v53 = vpop.permute.xlu0 %318 }
  0xc0   : > { %343 = vrot.lane.b32.xlu0 %v324_v46, %s895_s27  ;;  %341 = vrot.lane.b32.xlu1 %v323_v47, %s895_s27  ;;  %v328_v57 = vmul.f32 %v319_v53, %v288_v54  ;;  %v98_v46 = vmul.f32 %v1012_v19, %v50_v40  ;;  %v52_v47 = vmul.f32 %v931_v0, %v1042_v41 }
  0xc1   : > { %v307_v50 = vpop.permute.xlu1 %306  ;;  %v46_v54 = vmul.f32 %v931_v0, %v1026_v24  ;;  %v99_v40 = vmul.f32 %v1018_v22, %v51_v34 }
  0xc2   : > { %v325_v52 = vmul.f32 %v307_v50, %v285_v49  ;;  %v100_v17 = vmul.f32 %v1016_v21, %v52_v47 }
  0xc4   : > { %347 = vrot.lane.b32.xlu0 %v326_v51, %s895_s27  ;;  %345 = vrot.lane.b32.xlu1 %v325_v52, %s895_s27  ;;  %v375_v60 = vpop.permute.xlu0 %374  ;;  %v45_v52 = vmul.f32 %v931_v0, %v1024_v23 }
  0xc5   : > { %v315_v56 = vpop.permute.xlu1 %314  ;;  %v402_v63 = vmul.f32 %v375_v60, %v1026_v24  ;;  %v94_v60 = vmul.f32 %v1010_v18, %v46_v54 }
  0xc6   : > { %v327_v58 = vmul.f32 %v315_v56, %v287_v55  ;;  %v93_v19 = vmul.f32 %v1006_v16, %v45_v52 }
  0xc8   : > { %351 = vrot.lane.b32.xlu0 %v328_v57, %s895_s27  ;;  %349 = vrot.lane.b32.xlu1 %v327_v58, %s895_s27 }
  0xca   : > { %v371_v59 = vpop.permute.xlu1 %370 }
  0xcb   : > { %v401_v62 = vmul.f32 %v371_v59, %v1024_v23  ;;  %v47_v59 = vmul.f32 %v931_v0, %v1030_v29 }
  0xcc   : > { %386 = vperm.xlu0 %869, %v964_v8   ;;  %390 = vperm.xlu1 %868, %v962_v7  }
  0xcd   : > { %v95_v21 = vmul.f32 %v1004_v15, %v47_v59 }
  0xce   : > { %v379_v61 = vpop.permute.xlu1 %378 }
  0xcf   : > { %v403_v11 = vmul.f32 %v379_v61, %v1030_v29 }
  0xd0   : > { %394 = vperm.xlu0 %869, %v970_v10   ;;  %398 = vperm.xlu1 %868, %v968_v9  }
  0xd2   : > { %v383_v2 = vpop.permute.xlu1 %382 }
  0xd3   : > { %v404_v12 = vmul.f32 %v383_v2, %v1032_v30 }
  0xd4   : > { %417 = vrot.lane.b32.xlu0 %v401_v62, %s896_s28  ;;  %419 = vrot.lane.b32.xlu1 %v402_v63, %s896_s28 }
  0xd5   : > { %870 = vset.pattern.permute.xlu1 %v897_v13  ;;  %871 = vset.pattern.permute.xlu0 %v897_v13 }
  0xd8   : > { %421 = vrot.lane.b32.xlu0 %v403_v11, %s896_s28  ;;  %423 = vrot.lane.b32.xlu1 %v404_v12, %s896_s28  ;;  %v49_v11 = vmul.f32 %v931_v0, %v1038_v36 }
 0x106   : > { %v152_v14 = vpop.permute.xlu0 %151  ;;  %v150_v25 = vpop.permute.xlu1 %149 }
 0x107   : > { %v173_v61 = vadd.f32 %v150_v25, %v93_v19  ;;  %v174_v62 = vadd.f32 %v152_v14, %v94_v60 }
 0x10a   : > { %v156_v26 = vpop.permute.xlu0 %155  ;;  %v154_v27 = vpop.permute.xlu1 %153 }
 0x10b   : > { %v176_v43 = vadd.f32 %v156_v26, %v96_v39  ;;  %v175_v16 = vadd.f32 %v154_v27, %v95_v21 }
 0x10e   : > { %v160_v28 = vpop.permute.xlu0 %159  ;;  %v158_v31 = vpop.permute.xlu1 %157 }
 0x10f   : > { %v178_v49 = vadd.f32 %v160_v28, %v98_v46 }
 0x112   : > { %v164_v32 = vpop.permute.xlu0 %163  ;;  %v162_v33 = vpop.permute.xlu1 %161 }
 0x113   : > { %v180_v55 = vadd.f32 %v164_v32, %v100_v17  ;;  %v97_v32 = vmul.f32 %v1014_v20, %v49_v11  ;;  %v179_v27 = vadd.f32 %v162_v33, %v99_v40 }
 0x118   : > { %v246_v37 = vpop.permute.xlu1 %245 }
 0x119   : > { %v269_v63 = vadd.f32 %v246_v37, %v173_v61  ;;  %v177_v37 = vadd.f32 %v158_v31, %v97_v32 }
 0x11a   : > { %v248_v38 = vpop.permute.xlu0 %247 }
 0x11b   : > { %v270_v12 = vadd.f32 %v248_v38, %v174_v62 }
 0x11e   : > { %v252_v44 = vpop.permute.xlu0 %251  ;;  %v250_v45 = vpop.permute.xlu1 %249 }
 0x11f   : > { %v272_v48 = vadd.f32 %v252_v44, %v176_v43  ;;  %v271_v18 = vadd.f32 %v250_v45, %v175_v16 }
 0x122   : > { %v256_v50 = vpop.permute.xlu0 %255  ;;  %v254_v51 = vpop.permute.xlu1 %253 }
 0x123   : > { %v274_v53 = vadd.f32 %v256_v50, %v178_v49  ;;  %v273_v38 = vadd.f32 %v254_v51, %v177_v37 }
 0x126   : > { %v260_v56 = vpop.permute.xlu0 %259  ;;  %v258_v58 = vpop.permute.xlu1 %257 }
 0x127   : > { %v276_v57 = vadd.f32 %v260_v56, %v180_v55  ;;  %v275_v20 = vadd.f32 %v258_v58, %v179_v27  ;;  %v899_v58 = vmov 6  }
 0x12c   : > { %v338_v2 = vpop.permute.xlu1 %337 }
 0x12d   : > { %v361_v13 = vadd.f32 %v338_v2, %v269_v63 }
 0x12e   : > { %v340_v26 = vpop.permute.xlu0 %339 }
 0x12f   : > { %v362_v28 = vadd.f32 %v340_v26, %v270_v12 }
 0x132   : > { %v344_v25 = vpop.permute.xlu0 %343  ;;  %v342_v14 = vpop.permute.xlu1 %341 }
 0x133   : > { %v1099_v39 = vadd.f32 %v344_v25, %v272_v48  ;;  %v1101_v15 = vadd.f32 %v342_v14, %v271_v18 }
 0x136   : > { %v348_v43 = vpop.permute.xlu0 %347  ;;  %v346_v44 = vpop.permute.xlu1 %345 }
 0x137   : > { %v366_v46 = vadd.f32 %v348_v43, %v274_v53  ;;  %v365_v47 = vadd.f32 %v346_v44, %v273_v38 }
 0x13a   : > { %v352_v49 = vpop.permute.xlu0 %351  ;;  %v350_v50 = vpop.permute.xlu1 %349 }
 0x13b   : > { %v368_v52 = vadd.f32 %v352_v49, %v276_v57  ;;  %v367_v45 = vadd.f32 %v350_v50, %v275_v20 }
 0x147   : > { %v387_v17 = vpop.permute.xlu0 %386  ;;  %v391_v54 = vpop.permute.xlu1 %390 }
 0x148   : > { %v405_v31 = vmul.f32 %v387_v17, %v1038_v36  ;;  %v406_v48 = vmul.f32 %v391_v54, %v1036_v35 }
 0x14a   : > { %425 = vrot.lane.b32.xlu0 %v405_v31, %s896_s28  ;;  %427 = vrot.lane.b32.xlu1 %v406_v48, %s896_s28 }
 0x14b   : > { %v395_v22 = vpop.permute.xlu0 %394  ;;  %v399_v51 = vpop.permute.xlu1 %398 }
 0x14c   : > { %v407_v33 = vmul.f32 %v395_v22, %v1044_v42  ;;  %v408_v53 = vmul.f32 %v399_v51, %v1042_v41  ;;  %v902_v22 = vmov 7   ;;  %v903_v51 = vmov 8  }
 0x14e   : > { %429 = vrot.lane.b32.xlu0 %v407_v33, %s896_s28  ;;  %431 = vrot.lane.b32.xlu1 %v408_v53, %s896_s28 }
 0x14f   : > { %v418_v55 = vpop.permute.xlu0 %417  ;;  %v420_v56 = vpop.permute.xlu1 %419 }
 0x150   : > { %v1112_v19 = vadd.f32 %v418_v55, %v361_v13  ;;  %v1114_v57 = vadd.f32 %v420_v56, %v362_v28 }
 0x152   : > { %449 = vrot.lane.b32.xlu0 %v936_v1, %s898_s29  ;;  %461 = vperm.xlu1 %870, %v952_v4  }
 0x153   : > { %v1125_v59 = vpop.permute.xlu0 %421  ;;  %v1127_v60 = vpop.permute.xlu1 %423 }
 0x156   : > { %465 = vperm.xlu0 %871, %v958_v6   ;;  %469 = vperm.xlu1 %870, %v950_v3  }
 0x15a   : > { %477 = vperm.xlu0 %871, %v964_v8   ;;  %473 = vperm.xlu1 %870, %v956_v5  }
 0x15e   : > { %485 = vperm.xlu0 %871, %v970_v10   ;;  %481 = vperm.xlu1 %870, %v962_v7  }
 0x162   : > { %489 = vperm.xlu1 %870, %v968_v9   ;;  %873 = vset.pattern.permute.xlu0 %v899_v58 }
 0x166   : > { %872 = vset.pattern.permute.xlu1 %v899_v58 }
 0x1bc   : > { %v426_v61 = vpop.permute.xlu0 %425  ;;  %v428_v62 = vpop.permute.xlu1 %427 }
 0x1bd   : > { %v1129_v63 = vadd.f32 %v426_v61, %v365_v47  ;;  %v1131_v2 = vadd.f32 %v428_v62, %v366_v46 }
 0x1c0   : > { %v430_v21 = vpop.permute.xlu0 %429  ;;  %v432_v11 = vpop.permute.xlu1 %431 }
 0x1c1   : > { %v1133_v12 = vadd.f32 %v430_v21, %v367_v45  ;;  %v1135_v13 = vadd.f32 %v432_v11, %v368_v52 }
 0x1c4   : > { %v450_v26 = vpop.permute.xlu0 %449 }
 0x1c5   : > { %v452_v16 = vmul.f32 %v450_v26, %v1024_v23  ;;  %v453_v34 = vmul.f32 %v450_v26, %v1026_v24  ;;  %v454_v18 = vmul.f32 %v450_v26, %v1030_v29  ;;  %v456_v38 = vmul.f32 %v450_v26, %v1038_v36 }
 0x1c6   : > { %v455_v43 = vmul.f32 %v450_v26, %v1032_v30  ;;  %v458_v20 = vmul.f32 %v450_v26, %v1044_v42  ;;  %v457_v49 = vmul.f32 %v450_v26, %v1036_v35  ;;  %v459_v54 = vmul.f32 %v450_v26, %v1042_v41 }
 0x1cd   : > { %v462_v28 = vpop.permute.xlu1 %461 }
 0x1ce   : > { %v492_v32 = vmul.f32 %v462_v28, %v452_v16 }
 0x1d0   : > { %508 = vrot.lane.b32.xlu0 %v492_v32, %s900_s30 }
 0x1d1   : > { %v466_v25 = vpop.permute.xlu0 %465  ;;  %v470_v14 = vpop.permute.xlu1 %469 }
 0x1d2   : > { %v493_v37 = vmul.f32 %v466_v25, %v453_v34  ;;  %v494_v40 = vmul.f32 %v470_v14, %v454_v18 }
 0x1d4   : > { %510 = vrot.lane.b32.xlu1 %v493_v37, %s900_s30  ;;  %512 = vrot.lane.b32.xlu0 %v494_v40, %s900_s30 }
 0x1d5   : > { %v478_v44 = vpop.permute.xlu0 %477  ;;  %v474_v27 = vpop.permute.xlu1 %473 }
 0x1d6   : > { %v496_v46 = vmul.f32 %v478_v44, %v456_v38  ;;  %v495_v47 = vmul.f32 %v474_v27, %v455_v43 }
 0x1d8   : > { %516 = vrot.lane.b32.xlu0 %v496_v46, %s900_s30  ;;  %514 = vrot.lane.b32.xlu1 %v495_v47, %s900_s30 }
 0x1d9   : > { %v486_v50 = vpop.permute.xlu0 %485  ;;  %v482_v52 = vpop.permute.xlu1 %481 }
 0x1da   : > { %v498_v45 = vmul.f32 %v486_v50, %v458_v20  ;;  %v497_v17 = vmul.f32 %v482_v52, %v457_v49 }
 0x1dc   : > { %520 = vrot.lane.b32.xlu0 %v498_v45, %s900_s30  ;;  %518 = vrot.lane.b32.xlu1 %v497_v17, %s900_s30 }
 0x1dd   : > { %v490_v31 = vpop.permute.xlu1 %489 }
 0x1de   : > { %v499_v48 = vmul.f32 %v490_v31, %v459_v54 }
 0x1e0   : > { %540 = vrot.lane.b32.xlu0 %v931_v0, %s901_s4  ;;  %522 = vrot.lane.b32.xlu1 %v499_v48, %s900_s30 }
 0x1e4   : > { %556 = vperm.xlu0 %873, %v958_v6   ;;  %552 = vperm.xlu1 %872, %v952_v4  }
 0x1e8   : > { %568 = vperm.xlu0 %873, %v964_v8   ;;  %560 = vperm.xlu1 %872, %v950_v3  }
 0x1ec   : > { %576 = vperm.xlu0 %873, %v970_v10   ;;  %564 = vperm.xlu1 %872, %v956_v5  }
 0x1f0   : > { %874 = vset.pattern.permute.xlu0 %v902_v22  ;;  %572 = vperm.xlu1 %872, %v962_v7  }
 0x1f1   : > { %632 = vperm.xlu0 %874, %v952_v4  }
 0x1f4   : > { %580 = vperm.xlu1 %872, %v968_v9  }
 0x1f5   : > { %644 = vperm.xlu0 %874, %v956_v5  }
 0x1f8   : > { %875 = vset.pattern.permute.xlu1 %v902_v22 }
 0x1f9   : > { %652 = vperm.xlu0 %874, %v962_v7   ;;  %636 = vperm.xlu1 %875, %v958_v6  }
 0x1fd   : > { %660 = vperm.xlu0 %874, %v968_v9   ;;  %640 = vperm.xlu1 %875, %v950_v3  }
 0x201   : > { %877 = vset.pattern.permute.xlu0 %v903_v51  ;;  %648 = vperm.xlu1 %875, %v964_v8  }
 0x202   : > { %727 = vperm.xlu0 %877, %v958_v6  }
 0x205   : > { %656 = vperm.xlu1 %875, %v970_v10  }
 0x206   : > { %739 = vperm.xlu0 %877, %v964_v8   ;;  %v443_v8 = vadd.f32 %v1125_v59, %v1101_v15 }
 0x209   : > { %876 = vset.pattern.permute.xlu1 %v903_v51 }
 0x20a   : > { %747 = vperm.xlu0 %877, %v970_v10   ;;  %723 = vperm.xlu1 %876, %v952_v4  }
 0x20e   : > { %731 = vperm.xlu1 %876, %v950_v3   ;;  %711 = vrot.lane.b32.xlu0 %v936_v1, %s904_s5 }
 0x212   : > { %735 = vperm.xlu1 %876, %v956_v5   ;;  %v444_v5 = vadd.f32 %v1127_v60, %v1099_v39 }
 0x216   : > { %743 = vperm.xlu1 %876, %v962_v7  }
 0x21a   : > { %751 = vperm.xlu1 %876, %v968_v9  }
 0x242   : > { %v509_v6 = vpop.permute.xlu0 %508 }
 0x243   : > { %v1180_v33 = vadd.f32 %v509_v6, %v1112_v19 }
 0x246   : > { %v513_v10 = vpop.permute.xlu0 %512  ;;  %v511_v4 = vpop.permute.xlu1 %510 }
 0x247   : > { %v1184_v53 = vadd.f32 %v513_v10, %v443_v8  ;;  %v1187_v3 = vadd.f32 %v511_v4, %v1114_v57 }
 0x24a   : > { %v517_v7 = vpop.permute.xlu0 %516  ;;  %v515_v55 = vpop.permute.xlu1 %514 }
 0x24b   : > { %v1192_v9 = vadd.f32 %v517_v7, %v1129_v63  ;;  %v1194_v56 = vadd.f32 %v515_v55, %v444_v5 }
 0x24e   : > { %v521_v19 = vpop.permute.xlu0 %520  ;;  %v519_v58 = vpop.permute.xlu1 %518 }
 0x24f   : > { %v1197_v15 = vadd.f32 %v521_v19, %v1133_v12  ;;  %v1200_v59 = vadd.f32 %v519_v58, %v1131_v2 }
 0x252   : > { %v523_v57 = vpop.permute.xlu1 %522  ;;  %v541_v39 = vpop.permute.xlu0 %540 }
 0x253   : > { %v1203_v61 = vadd.f32 %v523_v57, %v1135_v13  ;;  %v544_v60 = vmul.f32 %v541_v39, %v1026_v24  ;;  %v543_v62 = vmul.f32 %v541_v39, %v1024_v23  ;;  %v545_v2 = vmul.f32 %v541_v39, %v1030_v29 }
 0x254   : > { %v547_v28 = vmul.f32 %v541_v39, %v1038_v36  ;;  %v546_v32 = vmul.f32 %v541_v39, %v1032_v30  ;;  %v549_v37 = vmul.f32 %v541_v39, %v1044_v42  ;;  %v548_v40 = vmul.f32 %v541_v39, %v1036_v35 }
 0x255   : > { %v550_v46 = vmul.f32 %v541_v39, %v1042_v41 }
 0x25f   : > { %v557_v63 = vpop.permute.xlu0 %556  ;;  %v553_v21 = vpop.permute.xlu1 %552 }
 0x260   : > { %v584_v11 = vmul.f32 %v557_v63, %v544_v60  ;;  %v583_v26 = vmul.f32 %v553_v21, %v543_v62 }
 0x262   : > { %601 = vrot.lane.b32.xlu0 %v584_v11, %s905_s6  ;;  %599 = vrot.lane.b32.xlu1 %v583_v26, %s905_s6 }
 0x263   : > { %v569_v12 = vpop.permute.xlu0 %568  ;;  %v561_v16 = vpop.permute.xlu1 %560 }
 0x264   : > { %v585_v13 = vmul.f32 %v561_v16, %v545_v2  ;;  %v587_v25 = vmul.f32 %v569_v12, %v547_v28 }
 0x266   : > { %603 = vrot.lane.b32.xlu1 %v585_v13, %s905_s6 }
 0x267   : > { %v577_v34 = vpop.permute.xlu0 %576  ;;  %v565_v18 = vpop.permute.xlu1 %564 }
 0x268   : > { %v586_v14 = vmul.f32 %v565_v18, %v546_v32  ;;  %v589_v43 = vmul.f32 %v577_v34, %v549_v37 }
 0x26a   : > { %607 = vrot.lane.b32.xlu1 %v587_v25, %s905_s6  ;;  %605 = vrot.lane.b32.xlu0 %v586_v14, %s905_s6 }
 0x26b   : > { %v573_v38 = vpop.permute.xlu1 %572 }
 0x26c   : > { %v588_v44 = vmul.f32 %v573_v38, %v548_v40  ;;  %v633_v27 = vpop.permute.xlu0 %632 }
 0x26d   : > { %v663_v20 = vmul.f32 %v633_v27, %v1024_v23 }
 0x26e   : > { %611 = vrot.lane.b32.xlu1 %v589_v43, %s905_s6  ;;  %609 = vrot.lane.b32.xlu0 %v588_v44, %s905_s6 }
 0x26f   : > { %v581_v47 = vpop.permute.xlu1 %580 }
 0x270   : > { %v590_v49 = vmul.f32 %v581_v47, %v550_v46  ;;  %v645_v50 = vpop.permute.xlu0 %644 }
 0x271   : > { %v666_v48 = vmul.f32 %v645_v50, %v1032_v30 }
 0x272   : > { %679 = vrot.lane.b32.xlu1 %v663_v20, %s906_s7  ;;  %613 = vrot.lane.b32.xlu0 %v590_v49, %s905_s6 }
 0x274   : > { %v653_v52 = vpop.permute.xlu0 %652  ;;  %v637_v45 = vpop.permute.xlu1 %636 }
 0x275   : > { %v664_v17 = vmul.f32 %v637_v45, %v1026_v24  ;;  %v668_v6 = vmul.f32 %v653_v52, %v1036_v35 }
 0x277   : > { %681 = vrot.lane.b32.xlu0 %v664_v17, %s906_s7 }
 0x278   : > { %v661_v54 = vpop.permute.xlu0 %660  ;;  %v641_v31 = vpop.permute.xlu1 %640 }
 0x279   : > { %v665_v22 = vmul.f32 %v641_v31, %v1030_v29  ;;  %v670_v5 = vmul.f32 %v661_v54, %v1042_v41 }
 0x27b   : > { %685 = vrot.lane.b32.xlu0 %v666_v48, %s906_s7  ;;  %683 = vrot.lane.b32.xlu1 %v665_v22, %s906_s7 }
 0x27c   : > { %v649_v51 = vpop.permute.xlu1 %648 }
 0x27d   : > { %v667_v8 = vmul.f32 %v649_v51, %v1038_v36  ;;  %v728_v10 = vpop.permute.xlu0 %727 }
 0x27f   : > { %689 = vrot.lane.b32.xlu0 %v668_v6, %s906_s7  ;;  %687 = vrot.lane.b32.xlu1 %v667_v8, %s906_s7 }
 0x280   : > { %v657_v4 = vpop.permute.xlu1 %656 }
 0x281   : > { %v669_v7 = vmul.f32 %v657_v4, %v1044_v42  ;;  %v740_v55 = vpop.permute.xlu0 %739 }
 0x283   : > { %693 = vrot.lane.b32.xlu0 %v670_v5, %s906_s7  ;;  %691 = vrot.lane.b32.xlu1 %v669_v7, %s906_s7 }
 0x285   : > { %v748_v19 = vpop.permute.xlu0 %747  ;;  %v724_v58 = vpop.permute.xlu1 %723 }
 0x289   : > { %v712_v57 = vpop.permute.xlu0 %711  ;;  %v732_v39 = vpop.permute.xlu1 %731 }
 0x28a   : > { %v715_v60 = vmul.f32 %v712_v57, %v1026_v24  ;;  %v714_v62 = vmul.f32 %v712_v57, %v1024_v23  ;;  %v716_v63 = vmul.f32 %v712_v57, %v1030_v29  ;;  %v717_v2 = vmul.f32 %v712_v57, %v1032_v30 }
 0x28b   : > { %v718_v13 = vmul.f32 %v712_v57, %v1038_v36  ;;  %v719_v32 = vmul.f32 %v712_v57, %v1036_v35  ;;  %v720_v29 = vmul.f32 %v712_v57, %v1044_v42  ;;  %v721_v18 = vmul.f32 %v712_v57, %v1042_v41 }
 0x28c   : > { %v755_v21 = vmul.f32 %v728_v10, %v715_v60  ;;  %v754_v11 = vmul.f32 %v724_v58, %v714_v62  ;;  %v756_v12 = vmul.f32 %v732_v39, %v716_v63 }
 0x28d   : > { %v736_v26 = vpop.permute.xlu1 %735  ;;  %v758_v24 = vmul.f32 %v740_v55, %v718_v13  ;;  %v760_v25 = vmul.f32 %v748_v19, %v720_v29 }
 0x28e   : > { %772 = vrot.lane.b32.xlu0 %v755_v21, %s907_s8  ;;  %770 = vrot.lane.b32.xlu1 %v754_v11, %s907_s8  ;;  %v757_v16 = vmul.f32 %v736_v26, %v717_v2 }
 0x291   : > { %v744_v28 = vpop.permute.xlu1 %743 }
 0x292   : > { %774 = vrot.lane.b32.xlu1 %v756_v12, %s907_s8  ;;  %776 = vrot.lane.b32.xlu0 %v757_v16, %s907_s8  ;;  %v759_v23 = vmul.f32 %v744_v28, %v719_v32 }
 0x295   : > { %v752_v34 = vpop.permute.xlu1 %751 }
 0x296   : > { %778 = vrot.lane.b32.xlu1 %v758_v24, %s907_s8  ;;  %780 = vrot.lane.b32.xlu0 %v759_v23, %s907_s8  ;;  %v761_v30 = vmul.f32 %v752_v34, %v721_v18 }
 0x29a   : > { %782 = vrot.lane.b32.xlu1 %v760_v25, %s907_s8  ;;  %784 = vrot.lane.b32.xlu0 %v761_v30, %s907_s8 }
 0x2d4   : > { %v600_v14 = vpop.permute.xlu1 %599  ;;  %v602_v36 = vpop.permute.xlu0 %601 }
 0x2d5   : > { %v624_v52 = vadd.f32 %v602_v36, %v1187_v3  ;;  %v623_v45 = vadd.f32 %v600_v14, %v1180_v33 }
 0x2d8   : > { %v604_v37 = vpop.permute.xlu1 %603 }
 0x2d9   : > { %v625_v22 = vadd.f32 %v604_v37, %v1184_v53 }
 0x2dc   : > { %v606_v40 = vpop.permute.xlu0 %605  ;;  %v608_v35 = vpop.permute.xlu1 %607 }
 0x2dd   : > { %v626_v51 = vadd.f32 %v606_v40, %v1194_v56  ;;  %v627_v5 = vadd.f32 %v608_v35, %v1192_v9 }
 0x2e0   : > { %v610_v38 = vpop.permute.xlu0 %609  ;;  %v612_v44 = vpop.permute.xlu1 %611 }
 0x2e1   : > { %v628_v7 = vadd.f32 %v610_v38, %v1200_v59  ;;  %v629_v39 = vadd.f32 %v612_v44, %v1197_v15 }
 0x2e4   : > { %v614_v43 = vpop.permute.xlu0 %613  ;;  %v680_v42 = vpop.permute.xlu1 %679 }
 0x2e5   : > { %v703_v17 = vadd.f32 %v680_v42, %v623_v45  ;;  %v630_v9 = vadd.f32 %v614_v43, %v1203_v61 }
 0x2e9   : > { %v682_v27 = vpop.permute.xlu0 %681 }
 0x2ea   : > { %v704_v54 = vadd.f32 %v682_v27, %v624_v52 }
 0x2ed   : > { %v686_v46 = vpop.permute.xlu0 %685  ;;  %v684_v47 = vpop.permute.xlu1 %683 }
 0x2ee   : > { %v706_v6 = vadd.f32 %v686_v46, %v626_v51  ;;  %v705_v8 = vadd.f32 %v684_v47, %v625_v22 }
 0x2f1   : > { %v690_v41 = vpop.permute.xlu0 %689  ;;  %v688_v20 = vpop.permute.xlu1 %687 }
 0x2f2   : > { %v708_v56 = vadd.f32 %v690_v41, %v628_v7  ;;  %v707_v19 = vadd.f32 %v688_v20, %v627_v5 }
 0x2f5   : > { %v694_v49 = vpop.permute.xlu0 %693  ;;  %v692_v50 = vpop.permute.xlu1 %691 }
 0x2f6   : > { %v710_v59 = vadd.f32 %v694_v49, %v630_v9  ;;  %v709_v63 = vadd.f32 %v692_v50, %v629_v39 }
 0x300   : > { %v773_v31 = vpop.permute.xlu0 %772  ;;  %v771_v48 = vpop.permute.xlu1 %770 }
 0x301   : > { %v795_v3 = vadd.f32 %v773_v31, %v704_v54  ;;  %v794_v33 = vadd.f32 %v771_v48, %v703_v17 }
 0x303   : > { %805 = vst.msk [vmem:[%s1243_s11 + $0x8] sm:$0xff] %vm803_vm0, %v795_v3  ;;  %804 = vst.msk [vmem:[%s1243_s11] sm:$0xff] %vm803_vm0, %v794_v33 }
 0x304   : > { %v777_v10 = vpop.permute.xlu0 %776  ;;  %v775_v4 = vpop.permute.xlu1 %774 }
 0x305   : > { %v797_v53 = vadd.f32 %v777_v10, %v706_v6  ;;  %v796_v55 = vadd.f32 %v775_v4, %v705_v8 }
 0x307   : > { %807 = vst.msk [vmem:[%s1243_s11 + $0x18] sm:$0xff] %vm803_vm0, %v797_v53  ;;  %806 = vst.msk [vmem:[%s1243_s11 + $0x10] sm:$0xff] %vm803_vm0, %v796_v55 }
 0x308   : > { %v781_v58 = vpop.permute.xlu0 %780  ;;  %v779_v57 = vpop.permute.xlu1 %778 }
 0x309   : > { %v799_v60 = vadd.f32 %v781_v58, %v708_v56  ;;  %v798_v62 = vadd.f32 %v779_v57, %v707_v19 }
 0x30b   : > { %809 = vst.msk [vmem:[%s1243_s11 + $0x28] sm:$0xff] %vm803_vm0, %v799_v60  ;;  %808 = vst.msk [vmem:[%s1243_s11 + $0x20] sm:$0xff] %vm803_vm0, %v798_v62  ;;  %20 = sbr.rel (!%p18_p0) target bundleno = 2 (0x2), region = 42 }
 0x30c   : > { %v785_v21 = vpop.permute.xlu0 %784  ;;  %v783_v11 = vpop.permute.xlu1 %782 }
 0x30d   : > { %v801_v26 = vadd.f32 %v785_v21, %v710_v59  ;;  %v800_v2 = vadd.f32 %v783_v11, %v709_v63 }
 0x30f   : > { %811 = vst.msk [vmem:[%s1243_s11 + $0x38] sm:$0xff] %vm803_vm0, %v801_v26  ;;  %810 = vst.msk [vmem:[%s1243_s11 + $0x30] sm:$0xff] %vm803_vm0, %v800_v2 }

</bundles_post_ra>
